<compile_context>
chip_gen: v5e
topology: v5e:2x2
jax: 0.10.0
libtpu: 0.0.40
codegen_flags: <defaults>
</compile_context>

<pallas_src>
import functools

import jax
import jax.numpy as jnp
from jax.experimental import pallas as pl
from jax.experimental.pallas import tpu as pltpu


def _round_up(n, m):
    return (n + m - 1) // m * m


def cnn_encoder_kernel(x_ref, w_ref, b_ref, o_ref):
    # x_ref: (TB, LC, Kp) bf16  -- im2col rows [x[t-1] | x[t] | x[t+1]], zero-padded K
    # w_ref: (Kp, Hp)     bf16  -- conv weight flattened tap-major (3*D, H), padded
    # b_ref: (1, Hp)      f32
    # o_ref: (TB, Hp)     f32   -- resident running max (pre-activation), finalized
    #                              with bias + ReLU on the last sequence chunk
    TB, LC, Kp = x_ref.shape
    Hp = o_ref.shape[-1]
    j = pl.program_id(1)

    @pl.when(j == 0)
    def _init():
        o_ref[...] = jnp.full(o_ref.shape, -jnp.inf, o_ref.dtype)

    # Single dense MXU matmul for this chunk (M = TB*LC, K = Kp).  LC is a
    # multiple of 16 so the bf16 reshape is a free view.
    x = x_ref[...].reshape(TB * LC, Kp)
    y = jnp.dot(x, w_ref[...], preferred_element_type=jnp.float32)   # (TB*LC, Hp) f32

    # Fold this chunk into the running max over the sequence axis.
    chunk_max = jnp.max(y.reshape(TB, LC, Hp), axis=1)               # (TB, Hp)
    o_ref[...] = jnp.maximum(o_ref[...], chunk_max)

    @pl.when(j == pl.num_programs(1) - 1)
    def _finalize():
        # max_t relu(y[t] + b) == relu(max_t y[t] + b): ReLU is monotone and
        # the bias is constant per channel, so bias + ReLU run once per tile.
        o_ref[...] = jnp.maximum(o_ref[...] + b_ref[...], 0.0)


@functools.partial(jax.jit, static_argnames=("tb", "lc"))
def cnn_sentence_encoder(word, pos1, pos2, params, *, tb=128, lc=16):
    # --- embedding (glue: data-dependent gathers + concat), in bf16 to halve
    #     the HBM traffic of the materialized activation.
    wv = params["word_vec"].astype(jnp.bfloat16)
    p1 = params["pos1_emb"].astype(jnp.bfloat16)
    p2 = params["pos2_emb"].astype(jnp.bfloat16)
    word_emb = jnp.take(wv, word, axis=0)             # (B, L, Dw)
    pos1_emb = jnp.take(p1, pos1, axis=0)             # (B, L, Dp)
    pos2_emb = jnp.take(p2, pos2, axis=0)             # (B, L, Dp)
    x = jnp.concatenate([word_emb, pos1_emb, pos2_emb], axis=-1)     # (B, L, D) bf16
    # TODO(synk): the gathers could be fused into the kernel via scalar-prefetched
    # ids + per-row DMA to avoid materializing the activation in HBM at all.

    B, L, D = x.shape
    w = params["conv_w"]                              # (3, D, H) f32
    b = params["conv_b"]                              # (1, H)    f32
    H = w.shape[-1]

    K = 3 * D                                         # dense im2col contraction depth
    K_pad = _round_up(K, 128)
    H_pad = _round_up(H, 128)
    LC = lc                                           # sequence chunk (multiple of 16)
    L_pad = _round_up(L, LC)

    # --- im2col: row t = [x[t-1] | x[t] | x[t+1]]  (Conv1d padding=1 edge zeros).
    xz = jnp.pad(x, ((0, 0), (1, 1), (0, 0)))
    xim = jnp.concatenate([xz[:, 0:L, :], xz[:, 1:L + 1, :], xz[:, 2:L + 2, :]],
                          axis=-1)                    # (B, L, 3D) bf16
    # Pad the sequence to a multiple of LC by replicating the last im2col row:
    # the replicated rows reproduce the t = L-1 conv output, so the max-pool
    # result is unchanged and the kernel needs no masking of padded time-steps.
    if L_pad > L:
        edge = jnp.broadcast_to(xim[:, L - 1:L, :], (B, L_pad - L, K))
        xim = jnp.concatenate([xim, edge], axis=1)    # (B, L_pad, 3D)

    # --- batch tile: keep >= 2 batch-grid steps when the batch allows it so the
    #     "parallel" axis can actually shard across both v7x TensorCores.
    if B >= 16:
        tb_cap = _round_up(-(-B // 2), 8)
    else:
        tb_cap = _round_up(B, 8)
    TB = min(tb, tb_cap)
    B_pad = _round_up(B, TB)

    # Zero-pad batch and the contraction depth (inert), keep bf16.
    xim = jnp.pad(xim, ((0, B_pad - B), (0, 0), (0, K_pad - K)))

    # Conv weight (3, D, H) -> (3*D, H), tap-major K ordering matching im2col.
    w_packed = jnp.pad(w.reshape(K, H),
                       ((0, K_pad - K), (0, H_pad - H))).astype(jnp.bfloat16)
    b_pad = jnp.pad(b, ((0, 0), (0, H_pad - H))).astype(jnp.float32)

    out = pl.pallas_call(
        cnn_encoder_kernel,
        out_shape=jax.ShapeDtypeStruct((B_pad, H_pad), jnp.float32),
        grid_spec=pltpu.PrefetchScalarGridSpec(
            num_scalar_prefetch=0,
            grid=(B_pad // TB, L_pad // LC),
            in_specs=[
                # activation: blocked over batch and sequence chunks
                pl.BlockSpec((TB, LC, K_pad), lambda i, j: (i, j, 0)),
                # weights / bias: constant block index -> fetched once
                pl.BlockSpec((K_pad, H_pad), lambda i, j: (0, 0)),
                pl.BlockSpec((1, H_pad), lambda i, j: (0, 0)),
            ],
            # output block index constant across the sequence axis -> resident
            # running-max accumulator (init / finalize via pl.when).
            out_specs=pl.BlockSpec((TB, H_pad), lambda i, j: (i, 0)),
        ),
        compiler_params=pltpu.CompilerParams(
            dimension_semantics=("parallel", "arbitrary"),
            vmem_limit_bytes=32 * 1024 * 1024,
        ),
    )(xim, w_packed, b_pad)

    return out[:B, :H]                                # strip batch / channel padding


def reference(word, pos1, pos2, params):
    # pure-JAX f32 reference mirroring the PyTorch forward
    word_emb = jnp.take(params["word_vec"], word, axis=0)
    pos1_emb = jnp.take(params["pos1_emb"], pos1, axis=0)
    pos2_emb = jnp.take(params["pos2_emb"], pos2, axis=0)
    x = jnp.concatenate([word_emb, pos1_emb, pos2_emb], axis=-1).astype(jnp.float32)
    B, L, D = x.shape
    w, b = params["conv_w"], params["conv_b"]
    x_pad = jnp.pad(x, ((0, 0), (1, 1), (0, 0)))
    y = (jnp.einsum("bld,dh->blh", x_pad[:, 0:L, :], w[0])
         + jnp.einsum("bld,dh->blh", x_pad[:, 1:L + 1, :], w[1])
         + jnp.einsum("bld,dh->blh", x_pad[:, 2:L + 2, :], w[2])
         + b[None])
    y = jnp.maximum(y, 0.0)
    return jnp.max(y, axis=1)                         # (B, H)


if __name__ == "__main__":
    # small, module-consistent shapes (L deliberately not a multiple of 16 so the
    # sequence edge-padding path is exercised and checked against the reference)
    B = 2            # batch
    L = 20           # max_length
    V = 20           # vocab size (word_vec_mat rows)
    Dw = 24          # word_embedding_dim
    Dp = 4           # pos_embedding_dim
    H = 32           # hidden_size
    D = Dw + 2 * Dp  # concatenated embedding dim

    key = jax.random.PRNGKey(0)
    k_wv, k_p1, k_p2, k_cw, k_cb, k_word, k_pos1, k_pos2 = jax.random.split(key, 8)

    params = {
        "word_vec": jax.random.normal(k_wv, (V, Dw), jnp.float32) * 0.1,
        "pos1_emb": jax.random.normal(k_p1, (2 * L, Dp), jnp.float32) * 0.1,
        "pos2_emb": jax.random.normal(k_p2, (2 * L, Dp), jnp.float32) * 0.1,
        # PyTorch Conv1d weight is (H, D, 3); stored here repacked as (3, D, H)
        "conv_w": jax.random.normal(k_cw, (3, D, H), jnp.float32) * 0.1,
        "conv_b": jax.random.normal(k_cb, (1, H), jnp.float32) * 0.1,
    }

    word = jax.random.randint(k_word, (B, L), 0, V, jnp.int32)
    pos1 = jax.random.randint(k_pos1, (B, L), 0, 2 * L, jnp.int32)
    pos2 = jax.random.randint(k_pos2, (B, L), 0, 2 * L, jnp.int32)

    out = jax.block_until_ready(cnn_sentence_encoder(word, pos1, pos2, params))
    ref = jax.block_until_ready(reference(word, pos1, pos2, params))

    assert out.shape == (B, H), out.shape
    # bf16 inputs / f32 accumulation -> loosen tolerance vs the f32 reference
    assert jnp.allclose(out, ref, atol=1e-2, rtol=1e-2), (out, ref)
    print("KERNEL_OK")
</pallas_src>

<mosaic_0001>
module attributes {stable_mosaic.version = 11 : i64} {
  func.func @cnn_encoder_kernel(%arg0: i32, %arg1: i32, %arg2: memref<8x16x128xbf16, #tpu.memory_space<vmem>>, %arg3: memref<128x128xbf16, #tpu.memory_space<vmem>>, %arg4: memref<1x128xf32, #tpu.memory_space<vmem>>, %arg5: memref<8x128xf32, #tpu.memory_space<vmem>>) attributes {dimension_semantics = [#tpu.dimension_semantics<parallel>, #tpu.dimension_semantics<arbitrary>], iteration_bounds = array<i64: 1, 2>, scalar_prefetch = 0 : i64, scratch_operands = 0 : i64, tpu.core_type = #tpu.core_type<tc>, window_params = [{transform_indices = @transform_0, window_bounds = array<i64: 8, 16, 128>}, {pipeline_mode = #tpu.pipeline_mode<synchronous>, transform_indices = @transform_1, window_bounds = array<i64: 128, 128>}, {pipeline_mode = #tpu.pipeline_mode<synchronous>, transform_indices = @transform_2, window_bounds = array<i64: 1, 128>}, {transform_indices = @transform_3, window_bounds = array<i64: 8, 128>}]} {
    %c0_i32 = arith.constant 0 : i32
    %0 = arith.cmpi eq, %arg1, %c0_i32 : i32
    %1 = arith.extui %0 : i1 to i32
    %c0_i32_0 = arith.constant 0 : i32
    %2 = arith.cmpi ne, %1, %c0_i32_0 : i32
    scf.if %2 {
      %cst_11 = arith.constant 0xFF800000 : f32
      %15 = vector.broadcast %cst_11 : f32 to vector<8x128xf32>
      %c0_12 = arith.constant 0 : index
      %c0_13 = arith.constant 0 : index
      %16 = vector.load %arg5[%c0_12, %c0_13] : memref<8x128xf32, #tpu.memory_space<vmem>>, vector<8x128xf32>
      tpu.vector_store %arg5[%c0_12, %c0_13], %15 {strides = array<i32>} : memref<8x128xf32, #tpu.memory_space<vmem>>, vector<8x128xf32>,
    } else {
    }
    %c0 = arith.constant 0 : index
    %c0_1 = arith.constant 0 : index
    %c0_2 = arith.constant 0 : index
    %3 = vector.load %arg2[%c0, %c0_1, %c0_2] : memref<8x16x128xbf16, #tpu.memory_space<vmem>>, vector<8x16x128xbf16>
    %4 = vector.shape_cast %3 : vector<8x16x128xbf16> to vector<128x128xbf16>
    %c0_3 = arith.constant 0 : index
    %c0_4 = arith.constant 0 : index
    %5 = vector.load %arg3[%c0_3, %c0_4] : memref<128x128xbf16, #tpu.memory_space<vmem>>, vector<128x128xbf16>
    %cst = arith.constant dense<0.000000e+00> : vector<128x128xf32>
    %6 = tpu.matmul %4, %5, %cst {dimension_numbers = #tpu.dot_dimension_numbers<[1], [0], [0], [1], [0, 0, 1, 1], [], []>} : vector<128x128xbf16>, vector<128x128xbf16>, vector<128x128xf32> -> vector<128x128xf32>
    %7 = vector.shape_cast %6 : vector<128x128xf32> to vector<8x16x128xf32>
    %cst_5 = arith.constant dense<0xFF800000> : vector<8x128xf32>
    %8 = vector.multi_reduction <maximumf>, %7, %cst_5 [1] : vector<8x16x128xf32> to vector<8x128xf32>
    %c0_6 = arith.constant 0 : index
    %c0_7 = arith.constant 0 : index
    %9 = vector.load %arg5[%c0_6, %c0_7] : memref<8x128xf32, #tpu.memory_space<vmem>>, vector<8x128xf32>
    %10 = arith.maximumf %9, %8 : vector<8x128xf32>
    %c0_8 = arith.constant 0 : index
    %c0_9 = arith.constant 0 : index
    %11 = vector.load %arg5[%c0_8, %c0_9] : memref<8x128xf32, #tpu.memory_space<vmem>>, vector<8x128xf32>
    tpu.vector_store %arg5[%c0_8, %c0_9], %10 {strides = array<i32>} : memref<8x128xf32, #tpu.memory_space<vmem>>, vector<8x128xf32>,
    %c1_i32 = arith.constant 1 : i32
    %12 = arith.cmpi eq, %arg1, %c1_i32 : i32
    %13 = arith.extui %12 : i1 to i32
    %c0_i32_10 = arith.constant 0 : i32
    %14 = arith.cmpi ne, %13, %c0_i32_10 : i32
    scf.if %14 {
      %c0_11 = arith.constant 0 : index
      %c0_12 = arith.constant 0 : index
      %15 = vector.load %arg5[%c0_11, %c0_12] : memref<8x128xf32, #tpu.memory_space<vmem>>, vector<8x128xf32>
      %c0_13 = arith.constant 0 : index
      %c0_14 = arith.constant 0 : index
      %16 = vector.load %arg4[%c0_13, %c0_14] : memref<1x128xf32, #tpu.memory_space<vmem>>, vector<1x128xf32>
      %17 = vector.broadcast %16 : vector<1x128xf32> to vector<8x128xf32>
      %18 = arith.addf %15, %17 : vector<8x128xf32>
      %cst_15 = arith.constant 0.000000e+00 : f32
      %19 = vector.broadcast %cst_15 : f32 to vector<8x128xf32>
      %20 = arith.maximumf %18, %19 : vector<8x128xf32>
      %c0_16 = arith.constant 0 : index
      %c0_17 = arith.constant 0 : index
      %21 = vector.load %arg5[%c0_16, %c0_17] : memref<8x128xf32, #tpu.memory_space<vmem>>, vector<8x128xf32>
      tpu.vector_store %arg5[%c0_16, %c0_17], %20 {strides = array<i32>} : memref<8x128xf32, #tpu.memory_space<vmem>>, vector<8x128xf32>,
    } else {
    }
    return
  }
  func.func @transform_0(%arg0: i32, %arg1: i32) -> (i32, i32, i32) {
    %c0_i32 = arith.constant 0 : i32
    %c0_i32_0 = arith.constant 0 : i32
    return %arg0, %arg1, %c0_i32 : i32, i32, i32
  }
  func.func @transform_1(%arg0: i32, %arg1: i32) -> (i32, i32) {
    %c0_i32 = arith.constant 0 : i32
    %c0_i32_0 = arith.constant 0 : i32
    %c0_i32_1 = arith.constant 0 : i32
    return %c0_i32, %c0_i32_0 : i32, i32
  }
  func.func @transform_2(%arg0: i32, %arg1: i32) -> (i32, i32) {
    %c0_i32 = arith.constant 0 : i32
    %c0_i32_0 = arith.constant 0 : i32
    %c0_i32_1 = arith.constant 0 : i32
    return %c0_i32, %c0_i32_0 : i32, i32
  }
  func.func @transform_3(%arg0: i32, %arg1: i32) -> (i32, i32) {
    %c0_i32 = arith.constant 0 : i32
    %c0_i32_0 = arith.constant 0 : i32
    return %arg0, %c0_i32 : i32, i32
  }
}

</mosaic_0001>

<bundles_post_ra>
// kernel: cnn_sentence_encoder.1
= control target key start
LH: loop header
LB: loop body
LE: loop exit
PB: predicated region body
PF: predicated region fallthrough
CT: control target
= control target key end

     0   :  { %s857_s12 = smov 0   ;;  %s859_s13 = smov 0   ;;  %s972_s0 = inlined_call_operand.vmem [shape: bf16[8,32,128], index: 0, kind: input, shape index: {}]   ;;  %s973_s1 = inlined_call_operand.vmem [shape: bf16[128,128], index: 1, kind: input, shape index: {}]   ;;  %s974_s2 = inlined_call_operand.vmem [shape: f32[1,128], index: 2, kind: input, shape index: {}]   ;;  %s975_s3 = inlined_call_operand.vmem [shape: f32[8,128], index: 3, kind: output, shape index: {}]  }
   0x1   :  { %s861_s14 = smov 0   ;;  %s863_s15 = smov 0  }
   0x2   :  { %s865_s16 = smov 0  }
   0x3 LB: > { %s22_s17 = sadd.s32 1, %s830_s15  ;;  %p41_p1 = scmp.ne.s32.totalorder %s822_s13, %s818_s12  ;;  %s834_s16 = sphi %s865_s16, %s13_s16   ;;  %s830_s15 = sphi %s863_s15, %s979_s15   ;;  %s826_s14 = sphi %s861_s14, %s978_s14   ;;  %s822_s13 = sphi %s859_s13, %s977_s13   ;;  %s818_s12 = sphi %s857_s12, %s976_s12  }
   0x4   : > { %p23_p0 = scmp.ge.s32.totalorder %s22_s17, 2  ;;  %p42_p2 = scmp.eq.s32.totalorder %s834_s16, 0 }
   0x5   : > { %s34_s19 = sadd.s32 1, %s822_s13  ;;  %p638_p5 = scmp.ge.s32.totalorder %s834_s16, 2 }
   0x6   : > { %s981_s17 = smov (%p23_p0, %s22_s17), 0  ;;  %p43_p3 = por %p42_p2, %p41_p1 }
   0x7   : > { %s30_s18 = ssub.s32 %s830_s15, %s981_s17  ;;  %141 = sbr.rel (%p638_p5) target bundleno = 24 (0x18), region = 24 }
   0x8   : > { %p32_p4 = scmp.eq.s32.totalorder %s30_s18, 0 }
   0xa   : > { %s892_s20 = scalar_select %p32_p4, %s822_s13, %s34_s19  }
   0xc   : > { %144 = sbr.rel (!%p43_p3) target bundleno = 24 (0x18), region = 28  ;;  %s146_s21 = sand.u32 (%p43_p3), 1, %s822_s13  }
   0xd   : > { %s713_s22 = sshll.u32 (%p43_p3), %s830_s15, 3  ;;  %s639_s23 = sshll.u32 (%p43_p3), %s146_s21, 6 }
   0xe   : > { %s154_s26 = scalar_lea.vmem (%p43_p3), %s972_s0, %s713_s22  ;;  %s148_s27 = scalar_lea.vmem (%p43_p3), [#allocation2], %s639_s23 }
   0xf   : > { %v171_v0 = vld [vmem:[%s154_s26] sm:$0xff] (%p43_p3)   ;;  %v175_v1 = vld [vmem:[%s154_s26 + $0x10] sm:$0xff] (%p43_p3)  }
  0x10   : > { %v179_v2 = vld [vmem:[%s154_s26 + $0x20] sm:$0xff] (%p43_p3)   ;;  %172 = vst [vmem:[%s148_s27] sm:$0xff] (%p43_p3), %v171_v0   ;;  %v183_v3 = vld [vmem:[%s154_s26 + $0x30] sm:$0xff] (%p43_p3)  }
  0x11   : > { %176 = vst [vmem:[%s148_s27 + $0x8] sm:$0xff] %v175_v1   ;;  %v187_v4 = vld [vmem:[%s154_s26 + $0x40] sm:$0xff]   ;;  %v191_v5 = vld [vmem:[%s154_s26 + $0x50] sm:$0xff]  }
  0x12   : > { %180 = vst [vmem:[%s148_s27 + $0x10] sm:$0xff] %v179_v2   ;;  %v195_v6 = vld [vmem:[%s154_s26 + $0x60] sm:$0xff]   ;;  %v199_v7 = vld [vmem:[%s154_s26 + $0x70] sm:$0xff]  }
  0x13   : > { %184 = vst [vmem:[%s148_s27 + $0x18] sm:$0xff] %v183_v3  }
  0x14   : > { %188 = vst [vmem:[%s148_s27 + $0x20] sm:$0xff] %v187_v4  }
  0x15   : > { %192 = vst [vmem:[%s148_s27 + $0x28] sm:$0xff] %v191_v5  }
  0x16   : > { %196 = vst [vmem:[%s148_s27 + $0x30] sm:$0xff] %v195_v6  }
  0x17   : > { %200 = vst [vmem:[%s148_s27 + $0x38] sm:$0xff] %v199_v7  }
  0x18 PF: > { %p642_p6 = scmp.ge.s32.totalorder %s834_s16, 1  ;;  %p257_p7 = scmp.lt.s32.totalorder %s834_s16, 3 }
  0x1a   : > { %p258_p8 = pnand %p642_p6, %p257_p7 }
  0x1b   : > { %s264_s28 = sand.u32 (!%p258_p8), 1, %s818_s12   ;;  %p644_p9 = scmp.ne.s32.totalorder (!%p258_p8), %s826_s14, 0 }
  0x1c   : > { %261 = sbr.rel (%p258_p8) target bundleno = 261 (0x105), region = 69  ;;  %s643_s29 = sshll.u32 (!%p258_p8), %s264_s28, 6 }
  0x1d   : > { %s903_s30 = scalar_lea.vmem (!%p258_p8), [#allocation2], %s643_s29 }
  0x21   : > { %295 = sbr.rel (%p644_p9) target bundleno = 40 (0x28), region = 77 }
  0x26   : > { %v836_v8 = vmov -inf  }
  0x27   : > { %296 = vst [vmem:[%s975_s3] sm:$0xff] %v836_v8 }
  0x28 PF: > { %v729_v9 = vld [vmem:[%s973_s1 + $0x38] sm:$0xff]  ;;  %v728_v10 = vld [vmem:[%s973_s1 + $0x30] sm:$0xff]  ;;  %v727_v11 = vld [vmem:[%s973_s1 + $0x28] sm:$0xff]  ;;  %vm539_vm0 = vcmask 1041409   ;;  %vm541_vm1 = vcmask 1042434   ;;  %vm543_vm2 = vcmask 1043459  }
  0x29   : > { %425 = vmatpush.bf16.msra.mxu0 %v729_v9  ;;  %730 = vmatpush.bf16.msra.mxu1 %v729_v9  ;;  %v726_v12 = vld [vmem:[%s973_s1 + $0x20] sm:$0xff]  ;;  %v725_v13 = vld [vmem:[%s973_s1 + $0x18] sm:$0xff]  ;;  %v724_v14 = vld [vmem:[%s973_s1 + $0x10] sm:$0xff]  ;;  %vm545_vm3 = vcmask 1044484   ;;  %vm547_vm4 = vcmask 1045509   ;;  %vm549_vm5 = vcmask 1046534  }
  0x2a   : > { %731 = vmatpush.bf16.msra.mxu2 %v729_v9  ;;  %732 = vmatpush.bf16.msra.mxu3 %v729_v9  ;;  %v723_v15 = vld [vmem:[%s973_s1 + $0x8] sm:$0xff]  ;;  %v722_v16 = vld [vmem:[%s973_s1] sm:$0xff]  ;;  %v716_v18 = vld [vmem:[%s903_s30 + $0x10] sm:$0xff]  ;;  %vm551_vm6 = vcmask 1047559   ;;  %p709_p10 = scmp.ne.s32.totalorder %s826_s14, 1 }
  0x2b   : > { %v714_v17 = vld [vmem:[%s903_s30] sm:$0xff]  ;;  %v720_v20 = vld [vmem:[%s903_s30 + $0x30] sm:$0xff]  ;;  %v715_v21 = vld [vmem:[%s903_s30 + $0x8] sm:$0xff] }
  0x2c   : > { %v718_v19 = vld [vmem:[%s903_s30 + $0x20] sm:$0xff]  ;;  %v717_v22 = vld [vmem:[%s903_s30 + $0x18] sm:$0xff]  ;;  %v719_v23 = vld [vmem:[%s903_s30 + $0x28] sm:$0xff] }
  0x2d   : > { %426 = vmatpush.bf16.msra.mxu0 %v728_v10  ;;  %733 = vmatpush.bf16.msra.mxu1 %v728_v10  ;;  %v721_v24 = vld [vmem:[%s903_s30 + $0x38] sm:$0xff] }
  0x2e   : > { %734 = vmatpush.bf16.msra.mxu2 %v728_v10  ;;  %735 = vmatpush.bf16.msra.mxu3 %v728_v10 }
  0x31   : > { %427 = vmatpush.bf16.msra.mxu0 %v727_v11  ;;  %736 = vmatpush.bf16.msra.mxu1 %v727_v11 }
  0x32   : > { %737 = vmatpush.bf16.msra.mxu2 %v727_v11  ;;  %738 = vmatpush.bf16.msra.mxu3 %v727_v11 }
  0x35   : > { %428 = vmatpush.bf16.msra.mxu0 %v726_v12  ;;  %739 = vmatpush.bf16.msra.mxu1 %v726_v12 }
  0x36   : > { %740 = vmatpush.bf16.msra.mxu2 %v726_v12  ;;  %741 = vmatpush.bf16.msra.mxu3 %v726_v12 }
  0x39   : > { %429 = vmatpush.bf16.msra.mxu0 %v725_v13  ;;  %742 = vmatpush.bf16.msra.mxu1 %v725_v13 }
  0x3a   : > { %743 = vmatpush.bf16.msra.mxu2 %v725_v13  ;;  %744 = vmatpush.bf16.msra.mxu3 %v725_v13 }
  0x3d   : > { %430 = vmatpush.bf16.msra.mxu0 %v724_v14  ;;  %745 = vmatpush.bf16.msra.mxu1 %v724_v14 }
  0x3e   : > { %746 = vmatpush.bf16.msra.mxu2 %v724_v14  ;;  %747 = vmatpush.bf16.msra.mxu3 %v724_v14 }
  0x41   : > { %431 = vmatpush.bf16.msra.mxu0 %v723_v15  ;;  %748 = vmatpush.bf16.msra.mxu1 %v723_v15 }
  0x42   : > { %749 = vmatpush.bf16.msra.mxu2 %v723_v15  ;;  %750 = vmatpush.bf16.msra.mxu3 %v723_v15 }
  0x45   : > { %432 = vmatpush.bf16.msra.mxu0 %v722_v16  ;;  %751 = vmatpush.bf16.msra.mxu1 %v722_v16 }
  0x46   : > { %752 = vmatpush.bf16.msra.mxu2 %v722_v16  ;;  %753 = vmatpush.bf16.msra.mxu3 %v722_v16 }
  0x48   : > { %433 = vmatmul.bf16.vlgmr.msra.gmra.mxu0 %v714_v17  ;;  %443 = vmatmul.bf16.vlgmr.msra.gmra.mxu1 %v716_v18 }
  0x49   : > { %453 = vmatmul.bf16.vlgmr.msra.gmra.mxu2 %v718_v19  ;;  %463 = vmatmul.bf16.vlgmr.msra.gmra.mxu3 %v720_v20 }
  0x58   : > { %438 = vmatmul.bf16.gmra.mxu0 %v715_v21  ;;  %448 = vmatmul.bf16.gmra.mxu1 %v717_v22 }
  0x59   : > { %458 = vmatmul.bf16.gmra.mxu2 %v719_v23  ;;  %468 = vmatmul.bf16.gmra.mxu3 %v721_v24 }
  0xc5   : > { %v434_v25 = vpop.f32.mrf.mxu0  ;;  %v444_v26 = vpop.f32.mrf.mxu1 }
  0xcc   : > { %v454_v27 = vpop.f32.mrf.mxu2  ;;  %v464_v28 = vpop.f32.mrf.mxu3 }
  0xcd   : > { %v436_v29 = vpop.f32.mrf.mxu0  ;;  %v446_v30 = vpop.f32.mrf.mxu1 }
  0xce   : > { %v474_v31 = vmax.f32 %v434_v25, %v436_v29  ;;  %v488_v32 = vmax.f32 %v444_v26, %v446_v30 }
  0xd0   : > { %v475_v37 = vrot.slane %v474_v31, 4  ;;  %v489_v38 = vrot.slane %v488_v32, 4 }
  0xd2   : > { %v476_v40 = vmax.f32 %v474_v31, %v475_v37  ;;  %v490_v42 = vmax.f32 %v488_v32, %v489_v38  ;;  %v530_v38 = vld [vmem:[%s975_s3] sm:$0xff] }
  0xd4   : > { %v456_v33 = vpop.f32.mrf.mxu2  ;;  %v466_v34 = vpop.f32.mrf.mxu3  ;;  %v477_v48 = vrot.slane %v476_v40, 2  ;;  %v491_v52 = vrot.slane %v490_v42, 2 }
  0xd5   : > { %v439_v35 = vpop.f32.mrf.mxu0  ;;  %v449_v36 = vpop.f32.mrf.mxu1  ;;  %v502_v39 = vmax.f32 %v454_v27, %v456_v33  ;;  %v516_v41 = vmax.f32 %v464_v28, %v466_v34 }
  0xd6   : > { %v478_v56 = vmax.f32 %v476_v40, %v477_v48  ;;  %v492_v60 = vmax.f32 %v490_v42, %v491_v52 }
  0xd7   : > { %v503_v43 = vrot.slane %v502_v39, 4  ;;  %v517_v49 = vrot.slane %v516_v41, 4 }
  0xd8   : > { %v479_v4 = vrot.slane %v478_v56, 1  ;;  %v493_v8 = vrot.slane %v492_v60, 1 }
  0xd9   : > { %v504_v53 = vmax.f32 %v502_v39, %v503_v43  ;;  %v518_v57 = vmax.f32 %v516_v41, %v517_v49 }
  0xda   : > { %v480_v16 = vmax.f32 %v478_v56, %v479_v4  ;;  %v494_v19 = vmax.f32 %v492_v60, %v493_v8 }
  0xdb   : > { %v505_v61 = vrot.slane %v504_v53, 2  ;;  %v519_v5 = vrot.slane %v518_v57, 2 }
  0xdc   : > { %v459_v44 = vpop.f32.mrf.mxu2  ;;  %v469_v45 = vpop.f32.mrf.mxu3 }
  0xdd   : > { %v441_v46 = vpop.f32.mrf.mxu0  ;;  %v451_v47 = vpop.f32.mrf.mxu1  ;;  %v506_v11 = vmax.f32 %v504_v53, %v505_v61  ;;  %v520_v17 = vmax.f32 %v518_v57, %v519_v5 }
  0xde   : > { %v481_v50 = vmax.f32 %v439_v35, %v441_v46  ;;  %v495_v51 = vmax.f32 %v449_v36, %v451_v47 }
  0xdf   : > { %v507_v22 = vrot.slane %v506_v11, 1  ;;  %v521_v28 = vrot.slane %v520_v17, 1 }
  0xe0   : > { %v482_v54 = vrot.slane %v481_v50, 4  ;;  %v496_v55 = vrot.slane %v495_v51, 4 }
  0xe1   : > { %v508_v32 = vmax.f32 %v506_v11, %v507_v22  ;;  %v522_v34 = vmax.f32 %v520_v17, %v521_v28 }
  0xe2   : > { %v483_v58 = vmax.f32 %v481_v50, %v482_v54  ;;  %v497_v59 = vmax.f32 %v495_v51, %v496_v55 }
  0xe4   : > { %v484_v62 = vrot.slane %v483_v58, 2  ;;  %v498_v63 = vrot.slane %v497_v59, 2  ;;  %v461_v0 = vpop.f32.mrf.mxu2  ;;  %v471_v1 = vpop.f32.mrf.mxu3 }
  0xe5   : > { %v509_v2 = vmax.f32 %v459_v44, %v461_v0  ;;  %v523_v3 = vmax.f32 %v469_v45, %v471_v1 }
  0xe6   : > { %v485_v6 = vmax.f32 %v483_v58, %v484_v62  ;;  %v499_v7 = vmax.f32 %v497_v59, %v498_v63 }
  0xe7   : > { %v510_v9 = vrot.slane %v509_v2, 4  ;;  %v524_v10 = vrot.slane %v523_v3, 4 }
  0xe8   : > { %v486_v12 = vrot.slane %v485_v6, 1  ;;  %v500_v13 = vrot.slane %v499_v7, 1 }
  0xe9   : > { %v511_v14 = vmax.f32 %v509_v2, %v510_v9  ;;  %v525_v15 = vmax.f32 %v523_v3, %v524_v10 }
  0xea   : > { %v487_v18 = vmax.f32 %v485_v6, %v486_v12  ;;  %v501_v24 = vmax.f32 %v499_v7, %v500_v13 }
  0xeb   : > { %v512_v20 = vrot.slane %v511_v14, 2  ;;  %v526_v21 = vrot.slane %v525_v15, 2 }
  0xec   : > { %v540_v23 = vsel %vm539_vm0, %v487_v18, %v480_v16 }
  0xed   : > { %v542_v25 = vsel %vm541_vm1, %v494_v19, %v540_v23  ;;  %v513_v26 = vmax.f32 %v511_v14, %v512_v20  ;;  %v527_v27 = vmax.f32 %v525_v15, %v526_v21 }
  0xee   : > { %v544_v29 = vsel %vm543_vm2, %v501_v24, %v542_v25 }
  0xef   : > { %v514_v30 = vrot.slane %v513_v26, 1  ;;  %v528_v31 = vrot.slane %v527_v27, 1  ;;  %v546_v35 = vsel %vm545_vm3, %v508_v32, %v544_v29 }
  0xf1   : > { %v515_v33 = vmax.f32 %v513_v26, %v514_v30  ;;  %v529_v37 = vmax.f32 %v527_v27, %v528_v31 }
  0xf3   : > { %v548_v36 = vsel %vm547_vm4, %v515_v33, %v546_v35 }
  0xf4   : > { %v550_v39 = vsel %vm549_vm5, %v522_v34, %v548_v36  ;;  %559 = sbr.rel (%p709_p10) target bundleno = 261 (0x105), region = 81 }
  0xf5   : > { %v552_v40 = vsel %vm551_vm6, %v529_v37, %v550_v39 }
  0xf6   : > { %v554_v41 = vmax.f32 %v530_v38, %v552_v40 }
  0xf8   : > { %555 = vst [vmem:[%s975_s3] sm:$0xff] %v554_v41 }
  0xf9   : > { %v795_v43 = vld [vmem:[%s974_s2] ss:$0 sm:$0xff] }
  0xff   : > { %v560_v42 = vld [vmem:[%s975_s3] sm:$0xff] }
 0x100   : > { %v565_v44 = vadd.f32 %v795_v43, %v560_v42 }
 0x102   : > { %v566_v45 = vmax.f32 %v565_v44, 0.0 }
 0x104   : > { %567 = vst [vmem:[%s975_s3] sm:$0xff] %v566_v45 }
 0x105 PF: > { %s13_s16 = sadd.s32 1, %s834_s16   ;;  %s976_s12 = smov %s822_s13 }
 0x106   : > { %p10_p11 = scmp.ge.s32.totalorder %s13_s16, 4   ;;  %s977_s13 = smov %s892_s20 }
 0x107   : > { %s978_s14 = smov %s830_s15  ;;  %s979_s15 = smov %s981_s17 }
 0x108   :  { %12 = sbr.rel (!%p10_p11) target bundleno = 3 (0x3), region = 116 }

</bundles_post_ra>
